<compile_context>
chip_gen: v6e
topology: v6e:2x2x1
jax: 0.10.0
libtpu: 0.0.40
codegen_flags: <defaults>
</compile_context>

<pallas_src>
import math

import jax
import jax.numpy as jnp
from jax.experimental import pallas as pl
from jax.experimental.pallas import tpu as pltpu


def generate_positional_encoding(hiddendim: int, lens: int) -> jnp.ndarray:
    """Deterministic sinusoidal PE, identical math to the PyTorch module.

    Returns shape (1, lens, hiddendim), float32.
    """
    position = jnp.arange(0, lens, dtype=jnp.float32)[:, None]            # (lens, 1)
    div_term = jnp.exp(
        jnp.arange(0, hiddendim, 2, dtype=jnp.float32)
        * -(math.log(10000.0) / hiddendim)
    )                                                                     # (H//2,)
    angles = position * div_term                                          # (lens, H//2)
    pe = jnp.zeros((lens, hiddendim), dtype=jnp.float32)
    pe = pe.at[:, 0::2].set(jnp.sin(angles))
    pe = pe.at[:, 1::2].set(jnp.cos(angles))
    return pe[None, :, :]                                                 # (1, lens, H)


def _add_pe_kernel(x_ref, pe_ref, o_ref):
    # PE stays f32: the add promotes to f32 (matches torch semantics for
    # bf16 x + f32 pe) and only the store casts to the output dtype.
    o_ref[...] = (x_ref[...] + pe_ref[...]).astype(o_ref.dtype)


def _cdiv(a: int, b: int) -> int:
    return -(-a // b)


def _sublane_multiple(itemsize: int) -> int:
    # Packed dtypes pack along sublanes: bf16 vreg is [16,128], int8/fp8 [32,128].
    return {4: 8, 2: 16, 1: 32}.get(itemsize, 8)


def _vmem_budget_bytes() -> int:
    """~Half the physical VMEM, capped at 64 MiB (v5e/v6e: 64 MiB, v7x: 32 MiB)."""
    cap = 64 * 1024 * 1024
    try:
        info = pltpu.get_tpu_info()
        cap = int(getattr(info, "vmem_capacity_bytes", cap))
    except Exception:  # interpret mode / older runtimes
        pass
    return min(64 * 1024 * 1024, max(16 * 1024 * 1024, cap // 2))


def _per_block_target_bytes(vmem_budget: int) -> int:
    # x + out double-buffered (4 buffers) plus PE (2 buffers) -> leave slack.
    return max(512 * 1024, min(4 * 1024 * 1024, vmem_budget // 8))


def _choose_3d_tiles(B: int, S: int, H: int, itemsize: int, target: int):
    """Pick (Bt, ts): batch rows and sequence rows per block for the 3-D path."""
    sub = _sublane_multiple(itemsize)
    row_bytes = max(1, H * itemsize)
    rows = max(1, target // row_bytes)
    ts = max(sub, (rows // sub) * sub)
    if ts >= S:
        ts = S
        # Whole sequence fits under the target -> fold batch rows in too.
        bt = min(B, max(1, target // max(1, S * row_bytes)))
    else:
        bt = 1
    # v7x megacore: avoid a degenerate 1x1 parallel grid when batch can split.
    if bt >= B and _cdiv(S, ts) == 1 and B >= 2:
        bt = max(1, B // 2)
    return bt, ts


def _choose_lane_tile(B: int, SH: int, itemsize: int, target: int) -> int:
    """Lane tile for the flattened path: multiple of 128 or the full S*H.

    Accounts for sublane padding of the (B, tl) block when B < sublane width.
    """
    pad_rows = _cdiv(B, _sublane_multiple(itemsize)) * _sublane_multiple(itemsize)
    per_col_bytes = max(1, pad_rows * itemsize)
    cols = max(1, target // per_col_bytes)
    tl = (cols // 128) * 128
    if tl < 128:
        tl = 128
    return SH if tl >= SH else tl


def positional_encoding_forward(x: jnp.ndarray, pe: jnp.ndarray) -> jnp.ndarray:
    """x: (B, S, H), pe: (1, lens, H) float32 with lens >= S.  Returns x + pe[:, :S]."""
    B, S, H = x.shape
    lens = pe.shape[1]
    assert S <= lens, "sequence length exceeds pre-generated PE length"
    assert H == pe.shape[2], "hidden dim mismatch between x and positional encoding"

    itemsize = jnp.dtype(x.dtype).itemsize
    vmem_budget = _vmem_budget_bytes()
    target = _per_block_target_bytes(vmem_budget)

    if H % 128 == 0:
        # Lane-aligned hidden: tile sequence (and batch), batch-tile innermost so
        # the PE block index is constant across batch steps (DMA skipped).
        bt, ts = _choose_3d_tiles(B, S, H, itemsize, target)
        s_tiles = _cdiv(S, ts)
        b_tiles = _cdiv(B, bt)

        # Pass the full f32 PE (no wrapper slice/cast copy) when the padded
        # tiling stays within lens; otherwise take the cheap f32 slice so the
        # last PE block never addresses rows past the buffer.
        if s_tiles * ts <= lens:
            pe_in = pe
        else:
            pe_in = pe[:, :S, :]

        return pl.pallas_call(
            _add_pe_kernel,
            out_shape=jax.ShapeDtypeStruct((B, S, H), x.dtype),
            grid_spec=pltpu.PrefetchScalarGridSpec(
                num_scalar_prefetch=0,
                grid=(s_tiles, b_tiles),
                in_specs=[
                    pl.BlockSpec((bt, ts, H), lambda s, b: (b, s, 0)),   # x tile
                    pl.BlockSpec((1, ts, H), lambda s, b: (0, s, 0)),    # PE tile (const in b)
                ],
                out_specs=pl.BlockSpec((bt, ts, H), lambda s, b: (b, s, 0)),
            ),
            compiler_params=pltpu.CompilerParams(
                dimension_semantics=("parallel", "parallel"),
                vmem_limit_bytes=vmem_budget,
            ),
        )(x, pe_in)

    # Narrow / unaligned hidden (e.g. H=32): flatten trailing dims so the last
    # block dim is >=128-lane dense (unmasked stores); PE is read exactly once.
    # The f32 reshape of the (small) PE slice is the only wrapper-side copy.
    SH = S * H
    x2 = x.reshape(B, SH)
    pe2 = pe[:, :S, :].reshape(1, SH)
    tl = _choose_lane_tile(B, SH, itemsize, target)
    out2 = pl.pallas_call(
        _add_pe_kernel,
        out_shape=jax.ShapeDtypeStruct((B, SH), x.dtype),
        grid_spec=pltpu.PrefetchScalarGridSpec(
            num_scalar_prefetch=0,
            grid=(_cdiv(SH, tl),),
            in_specs=[
                pl.BlockSpec((B, tl), lambda i: (0, i)),   # all batches for this chunk
                pl.BlockSpec((1, tl), lambda i: (0, i)),   # shared PE chunk (broadcasts)
            ],
            out_specs=pl.BlockSpec((B, tl), lambda i: (0, i)),
        ),
        compiler_params=pltpu.CompilerParams(
            dimension_semantics=("parallel",),
            vmem_limit_bytes=vmem_budget,
        ),
    )(x2, pe2)
    return out2.reshape(B, S, H)


if __name__ == "__main__":
    key = jax.random.PRNGKey(0)

    # Case 1: narrow hidden (H < 128) — exercises the flattened, lane-dense path.
    B, S, H, LENS = 2, 8, 32, 16
    x = jax.random.normal(key, (B, S, H), dtype=jnp.float32)
    pe = generate_positional_encoding(H, LENS)
    out = jax.block_until_ready(positional_encoding_forward(x, pe))
    ref = x + pe[:, :S, :]
    assert out.shape == (B, S, H)
    assert jnp.allclose(out, ref, atol=1e-6, rtol=1e-6), "mismatch vs reference (flattened path)"

    # Case 2: lane-aligned hidden (H % 128 == 0) — exercises the 3-D tiled path
    # (full-length PE passed straight through, no wrapper slice/cast).
    B2, S2, H2, LENS2 = 2, 16, 128, 32
    x2 = jax.random.normal(jax.random.fold_in(key, 1), (B2, S2, H2), dtype=jnp.float32)
    pe2 = generate_positional_encoding(H2, LENS2)
    out2 = jax.block_until_ready(positional_encoding_forward(x2, pe2))
    ref2 = x2 + pe2[:, :S2, :]
    assert out2.shape == (B2, S2, H2)
    assert jnp.allclose(out2, ref2, atol=1e-6, rtol=1e-6), "mismatch vs reference (3-D path)"

    # Case 3: bf16 activations — add happens in f32 (PE kept f32), cast at store.
    x3 = jax.random.normal(jax.random.fold_in(key, 2), (2, 16, 128), dtype=jnp.bfloat16)
    out3 = jax.block_until_ready(positional_encoding_forward(x3, pe2))
    ref3 = (x3.astype(jnp.float32) + pe2[:, :16, :]).astype(jnp.bfloat16)
    assert jnp.allclose(out3.astype(jnp.float32), ref3.astype(jnp.float32),
                        atol=1e-2, rtol=1e-2), "mismatch vs reference (bf16 path)"

    print("KERNEL_OK")
</pallas_src>

<mosaic_0001>
module attributes {stable_mosaic.version = 11 : i64} {
  func.func @_add_pe_kernel(%arg0: i32, %arg1: memref<2x256xf32, #tpu.memory_space<vmem>>, %arg2: memref<1x256xf32, #tpu.memory_space<vmem>>, %arg3: memref<2x256xf32, #tpu.memory_space<vmem>>) attributes {dimension_semantics = [#tpu.dimension_semantics<parallel>], iteration_bounds = array<i64: 1>, scalar_prefetch = 0 : i64, scratch_operands = 0 : i64, tpu.core_type = #tpu.core_type<tc>, window_params = [{transform_indices = @transform_0, window_bounds = array<i64: 2, 256>}, {transform_indices = @transform_1, window_bounds = array<i64: 1, 256>}, {transform_indices = @transform_2, window_bounds = array<i64: 2, 256>}]} {
    %c0 = arith.constant 0 : index
    %c0_0 = arith.constant 0 : index
    %0 = vector.load %arg1[%c0, %c0_0] : memref<2x256xf32, #tpu.memory_space<vmem>>, vector<2x256xf32>
    %c0_1 = arith.constant 0 : index
    %c0_2 = arith.constant 0 : index
    %1 = vector.load %arg2[%c0_1, %c0_2] : memref<1x256xf32, #tpu.memory_space<vmem>>, vector<1x256xf32>
    %2 = vector.broadcast %1 : vector<1x256xf32> to vector<2x256xf32>
    %3 = arith.addf %0, %2 : vector<2x256xf32>
    %c0_3 = arith.constant 0 : index
    %c0_4 = arith.constant 0 : index
    %4 = vector.load %arg3[%c0_3, %c0_4] : memref<2x256xf32, #tpu.memory_space<vmem>>, vector<2x256xf32>
    tpu.vector_store %arg3[%c0_3, %c0_4], %3 {strides = array<i32>} : memref<2x256xf32, #tpu.memory_space<vmem>>, vector<2x256xf32>,
    return
  }
  func.func @transform_0(%arg0: i32) -> (i32, i32) {
    %c0_i32 = arith.constant 0 : i32
    %c0_i32_0 = arith.constant 0 : i32
    return %c0_i32, %arg0 : i32, i32
  }
  func.func @transform_1(%arg0: i32) -> (i32, i32) {
    %c0_i32 = arith.constant 0 : i32
    %c0_i32_0 = arith.constant 0 : i32
    return %c0_i32, %arg0 : i32, i32
  }
  func.func @transform_2(%arg0: i32) -> (i32, i32) {
    %c0_i32 = arith.constant 0 : i32
    %c0_i32_0 = arith.constant 0 : i32
    return %c0_i32, %arg0 : i32, i32
  }
}

</mosaic_0001>

<bundles_post_ra>
// kernel: tpu_custom_call.1
= control target key start
LH: loop header
LB: loop body
LE: loop exit
PB: predicated region body
PF: predicated region fallthrough
CT: control target
= control target key end

     0   :  { %7 = vsyncpa [#allocation3], 0  ;;  %s172_s0 = inlined_call_operand.hbm [shape: f32[2,256], index: 0, kind: input, shape index: {}]   ;;  %s173_s1 = inlined_call_operand.hbm [shape: f32[1,256], index: 1, kind: input, shape index: {}]   ;;  %s174_s2 = inlined_call_operand.hbm [shape: f32[2,256], index: 2, kind: output, shape index: {}]  }
   0x1   :  { %8 = vsyncpa [#allocation6], 0 }
   0x2   :  { %9 = vsyncpa [#allocation4], 0  ;;  %s144_s9 = smov [#allocation2]   ;;  %s145_s11 = smov [#allocation5]  }
   0x3   :  { %s16_s10 = sshll.u32 %s144_s9, 4  ;;  %s26_s12 = sshll.u32 %s145_s11, 4  ;;  %s17_s10 = int_to_ptr.vmem [resolvable:$true] %s16_s10  ;;  %s27_s12 = int_to_ptr.vmem [resolvable:$true] %s26_s12 }
   0x4   :  { %s86_s13 = scalar_lea.vmem %s17_s10, 64  ;;  %p91_p1 = scmp.lt.s32.totalorder %s17_s10, %s17_s10 }
   0x5   :  { %p87_p0 = scmp.ne.s32.totalorder %s17_s10, %s86_s13  ;;  %p92_p2 = scmp.lt.s32.totalorder %s86_s13, %s86_s13 }
   0x7   :  { %p93_p3 = por %p92_p2, %p91_p1 }
   0x9   :  { %p94_p4 = pnand %p93_p3, %p87_p0 }
   0xb   :  { %97 = shalt.err (!%p94_p4)
}
   0xc   :  { %19 = dma.hbm_to_vmem [thread:$0]  %s172_s0, 64, %s17_s10, [#allocation3]  }
   0xd   :  { %s106_s16 = scalar_lea.vmem %s27_s12, 32  ;;  %p111_p6 = scmp.lt.s32.totalorder %s27_s12, %s27_s12 }
   0xe   :  { %p107_p5 = scmp.ne.s32.totalorder %s27_s12, %s106_s16  ;;  %p112_p7 = scmp.lt.s32.totalorder %s106_s16, %s106_s16 }
  0x10   :  { %p113_p8 = por %p112_p7, %p111_p6 }
  0x12   :  { %p114_p9 = pnand %p113_p8, %p107_p5 }
  0x14   :  { %117 = shalt.err (!%p114_p9)
}
  0x15   :  { %29 = dma.hbm_to_vmem [thread:$0]  %s173_s1, 32, %s27_s12, [#allocation6]  }
  0x16   :  { %138 = dma.done.wait [#allocation3], 64  }
  0x17   :  { %139 = vsyncadd [#allocation3], 4294967232 }
  0x18   :  { %140 = dma.done.wait [#allocation6], 32  }
  0x19   :  { %141 = vsyncadd [#allocation6], 4294967264  ;;  %v39_v0 = vlaneseq  ;;  %v146_v1 = vmov 1983009808   ;;  %v37_v7 = vld [vmem:[#allocation5] sm:$0x3] }
  0x1a   :  { %v49_v2 = vunpack.c.l.s4 %v146_v1  ;;  %v36_v12 = vld [vmem:[#allocation2] sm:$0xf]  ;;  %s147_s0 = smov [#allocation7]  }
  0x1b   :  { %v40_v3 = vshrl.u32 %v39_v0, 7  ;;  %s64_s19 = sshll.u32 %s147_s0, 4  ;;  %s65_s19 = int_to_ptr.vmem [resolvable:$true] %s64_s19 }
  0x1c   :  { %v50_v6 = vunpack.c.0.s8 %v49_v2  ;;  %s118_s1 = scalar_lea.vmem %s65_s19, 64  ;;  %p123_p11 = scmp.lt.s32.totalorder %s65_s19, %s65_s19 }
  0x1d   :  { %v41_v4 = vsub.s32 0, %v40_v3  ;;  %v45_v5 = vsub.s32 1, %v40_v3  ;;  %p119_p10 = scmp.ne.s32.totalorder %s65_s19, %s118_s1  ;;  %p124_p12 = scmp.lt.s32.totalorder %s118_s1, %s118_s1 }
  0x1e   :  { %v53_v10 = vsub.s32 %v50_v6, %v40_v3 }
  0x1f   :  { %v42_v8 = vrot.slane %v37_v7, %v41_v4  ;;  %v46_v9 = vrot.slane %v37_v7, %v45_v5  ;;  %p125_p13 = por %p124_p12, %p123_p11 }
  0x21   :  { %v47_v11 = vcombine.low %v42_v8, %v46_v9  ;;  %p126_p0 = pnand %p125_p13, %p119_p10 }
  0x23   :  { %v54_v13 = vrot.slane %v47_v11, %v53_v10 }
  0x25   :  { %v56_v14 = vadd.f32 %v54_v13, %v36_v12 }
  0x27   :  { %57 = vst [vmem:[#allocation7] sm:$0xf] %v56_v14 }
  0x28   :  { %129 = shalt.err (!%p126_p0)
}
  0x29   :  { %67 = dma.vmem_to_hbm [thread:$0]  %s65_s19, 64, %s174_s2, [#allocation4]  }
  0x2a   :  { %142 = dma.done.wait [#allocation4], 64  }
  0x2b   :  { %143 = vsyncadd [#allocation4], 4294967232 }
  0x2c   :  { %71 = vsyncpa [#allocation3], 1 }
  0x2d   :  { %72 = vsyncpa [#allocation6], 1 }
  0x2e   :  { %73 = vsyncpa [#allocation4], 1 }

</bundles_post_ra>
